<compile_context>
chip_gen: v7x
topology: tpu7x:2x2x1
jax: 0.10.0
libtpu: 0.0.40
codegen_flags: <defaults>
</compile_context>

<pallas_src>
import functools

import jax
import jax.numpy as jnp
from jax.experimental import pallas as pl
from jax.experimental.pallas import tpu as pltpu

_LANES = 128
_SUBLANES = 8
_MAX_TILE_B = 512


def _round_up(x, m):
    return (x + m - 1) // m * m


def _default_epilogue_dtype():
    """bf16 bias/ReLU epilogues only on chips with a bf16 VPU (v6e/v7x)."""
    try:
        kind = jax.devices()[0].device_kind.lower()
    except Exception:
        return jnp.float32
    if any(tag in kind for tag in ("v6", "v7", "7x")):
        return jnp.bfloat16
    return jnp.float32  # v5e / older: no bf16 VALU -> keep f32 epilogues


def _mlp_kernel(x_ref, w1_ref, w2_ref, w3_ref, const_ref, o_ref, *, epi_dtype):
    """One batch tile of the 4-layer MLP.

    x_ref     : (tile_b, in_pad) f32  (pipelined per grid step)
    w1..w3    : bf16 weight matrices, VMEM-resident (constant index_map)
    const_ref : (5, cpad) f32 packed constants:
                row 0: b1, row 1: b2, row 2: b3, row 3: w4[:, 0], row 4[0]: b4
    o_ref     : (tile_b, 1) f32 per-row result.
    """
    d1 = w1_ref.shape[1]
    d2 = w2_ref.shape[1]
    d3 = w3_ref.shape[1]

    b1 = const_ref[0:1, :d1].astype(epi_dtype)
    b2 = const_ref[1:2, :d2].astype(epi_dtype)
    b3 = const_ref[2:3, :d3].astype(epi_dtype)
    w4_row = const_ref[3:4, :d3]          # (1, d3) f32 output-layer weight column
    b4 = const_ref[4:5, 0:1]              # (1, 1)  f32

    # Cast x to bf16 in-kernel (VPU work hidden under the w1 matmul) instead of
    # materializing a bf16 copy of x in HBM from the wrapper.
    x = x_ref[...].astype(jnp.bfloat16)

    # linear1 + relu (MXU matmul, f32 accumulation)
    h = jnp.dot(x, w1_ref[...], preferred_element_type=jnp.float32)
    h = jnp.maximum(h.astype(epi_dtype) + b1, 0.0).astype(jnp.bfloat16)
    # linear2 + relu
    h = jnp.dot(h, w2_ref[...], preferred_element_type=jnp.float32)
    h = jnp.maximum(h.astype(epi_dtype) + b2, 0.0).astype(jnp.bfloat16)
    # linear3 + relu
    h = jnp.dot(h, w3_ref[...], preferred_element_type=jnp.float32)
    h = jnp.maximum(h.astype(epi_dtype) + b3, 0.0).astype(jnp.float32)
    # output layer: (tile_b, d3) @ (d3, 1) on the VPU (mul) + XLU (lane reduce)
    res = jnp.sum(h * w4_row, axis=-1, keepdims=True) + b4   # (tile_b, 1) f32
    # Narrow (tile_b, 1) output block: HBM writeback is 4 B/row (no 128-lane
    # broadcast write amplification).
    o_ref[...] = res


def prepare_params(params):
    """One-time packing/casting (outside the hot path)."""
    (w1, b1), (w2, b2), (w3, b3), (w4, b4) = params
    assert w4.shape[1] == 1, "output_dims must be 1 (out.squeeze(1) head)"
    in_dims, d1 = w1.shape
    d2 = w2.shape[1]
    d3 = w3.shape[1]
    # Pad layer-1's contraction dim to a lane multiple (zero rows are
    # numerically neutral) -> unmasked x loads and clean MXU K tiles.
    in_pad = _round_up(in_dims, _LANES)
    w1p = jnp.zeros((in_pad, d1), jnp.float32).at[:in_dims].set(
        w1.astype(jnp.float32))
    cpad = _round_up(max(d1, d2, d3), _LANES)
    const = jnp.zeros((5, cpad), jnp.float32)
    const = const.at[0, :d1].set(b1.astype(jnp.float32))
    const = const.at[1, :d2].set(b2.astype(jnp.float32))
    const = const.at[2, :d3].set(b3.astype(jnp.float32))
    const = const.at[3, :d3].set(w4[:, 0].astype(jnp.float32))
    const = const.at[4, 0].set(b4[0].astype(jnp.float32))
    return (w1p.astype(jnp.bfloat16), w2.astype(jnp.bfloat16),
            w3.astype(jnp.bfloat16), const)


def _pick_tile_b(batch):
    """Large batch tiles (up to 512 rows) amortize MXU weight pushes and
    per-step overhead; ~B/2 tiles give v7x's two TensorCores >=2 grid steps."""
    if batch <= _SUBLANES:
        return batch                       # one tiny tile == full batch
    half = -(-batch // 2)                  # cdiv(batch, 2)
    return min(_MAX_TILE_B, _round_up(half, _SUBLANES))


@jax.jit
def mlp_forward(x_nchw, prepared):
    """Full MLP forward pass. Returns shape (B,) (== torch out.squeeze(1))."""
    w1, w2, w3, const = prepared
    B = x_nchw.shape[0]
    in_dims = 1
    for s in x_nchw.shape[1:]:
        in_dims *= s
    in_pad = w1.shape[0]
    d1, d2, d3 = w1.shape[1], w2.shape[1], w3.shape[1]
    cpad = const.shape[1]

    # nn.Flatten(); keep f32 (bf16 cast happens inside the kernel).
    x2d = x_nchw.reshape(B, in_dims).astype(jnp.float32)
    if in_pad != in_dims:
        # Generic path only (demo's 1024 is already 128-aligned).
        x2d = jnp.pad(x2d, ((0, 0), (0, in_pad - in_dims)))

    tile_b = _pick_tile_b(B)

    w_bytes = (in_pad * d1 + d1 * d2 + d2 * d3) * 2          # bf16 weights
    # Resident weights don't need double buffers; only bother overriding the
    # default when they are big enough to matter (keeps demo path on defaults).
    single_buf_w = w_bytes > (4 << 20)
    w_buffers = 1 if single_buf_w else 2

    def vmem_estimate(tb):
        return (2 * tb * in_pad * 4          # x tile (f32, double-buffered)
                + w_buffers * w_bytes        # VMEM-resident weights
                + 2 * 8 * cpad * 4           # packed constants (sublane pad)
                + 2 * tb * _LANES * 4)       # out tile (lane-padded in VMEM)

    while tile_b > _SUBLANES and vmem_estimate(tile_b) > (40 << 20):
        tile_b = max(_SUBLANES, _round_up(tile_b // 2, _SUBLANES))

    num_tiles = -(-B // tile_b)              # ragged tail handled by Pallas
    rows = num_tiles * tile_b

    def w_spec(shape):
        if single_buf_w:
            return pl.BlockSpec(shape, lambda i: (0, 0),
                                pipeline_mode=pl.Buffered(1))
        return pl.BlockSpec(shape, lambda i: (0, 0))

    vmem_limit = int(min(max(vmem_estimate(tile_b) + (4 << 20), 16 << 20),
                         64 << 20))
    flops = 2 * rows * (in_pad * d1 + d1 * d2 + d2 * d3 + d3)
    bytes_accessed = (B * in_pad * 4         # x read once as f32
                      + w_bytes              # bf16 weights, read once
                      + 5 * cpad * 4         # packed constants
                      + rows * 4)            # narrow f32 output

    epi_dtype = _default_epilogue_dtype()
    kernel = functools.partial(_mlp_kernel, epi_dtype=epi_dtype)

    out = pl.pallas_call(
        kernel,
        grid=(num_tiles,),
        out_shape=jax.ShapeDtypeStruct((rows, 1), jnp.float32),
        in_specs=[
            pl.BlockSpec((tile_b, in_pad), lambda i: (i, 0)),   # x: pipelined
            w_spec((in_pad, d1)),                               # weights:
            w_spec((d1, d2)),                                   #   VMEM-resident
            w_spec((d2, d3)),                                   #   (const index)
            pl.BlockSpec((5, cpad), lambda i: (0, 0)),          # packed consts
        ],
        out_specs=pl.BlockSpec((tile_b, 1), lambda i: (i, 0)),
        compiler_params=pltpu.CompilerParams(
            dimension_semantics=("parallel",),   # shard grid steps across v7x TCs
            vmem_limit_bytes=vmem_limit),
        cost_estimate=pl.CostEstimate(
            flops=flops, transcendentals=0, bytes_accessed=bytes_accessed),
    )(x2d, w1, w2, w3, const)

    # torch: out.squeeze(1) -> (B,).  Ragged-tile garbage rows are sliced off.
    return out[:B, 0]


def init_params(key, input_dims, hidden_dims, output_dims):
    """PyTorch-style init: U(-1/sqrt(fan_in), 1/sqrt(fan_in)).
    Weights stored (in_features, out_features) so the kernel does x @ W."""
    layer_dims = [
        (input_dims, hidden_dims * 4),       # linear1
        (hidden_dims * 4, hidden_dims * 2),  # linear2
        (hidden_dims * 2, hidden_dims),      # linear3
        (hidden_dims, output_dims),          # output
    ]
    params = []
    for fan_in, fan_out in layer_dims:
        key, kw, kb = jax.random.split(key, 3)
        bound = 1.0 / (fan_in ** 0.5)
        w = jax.random.uniform(kw, (fan_in, fan_out), jnp.float32, -bound, bound)
        b = jax.random.uniform(kb, (fan_out,), jnp.float32, -bound, bound)
        params.append((w, b))
    return params


if __name__ == "__main__":
    key = jax.random.PRNGKey(0)
    k_x, k_p = jax.random.split(key)

    # Small image-like input, NCHW: batch=2, channels=4, spatial=16x16.
    B, C, H, W = 2, 4, 16, 16
    x = jax.random.normal(k_x, (B, C, H, W), dtype=jnp.float32)

    input_dims = C * H * W        # 1024 after Flatten
    hidden_dims = 32              # layers: 1024 -> 128 -> 64 -> 32 -> 1
    output_dims = 1               # squeeze(1) -> scalar regression head

    params = init_params(k_p, input_dims, hidden_dims, output_dims)
    prepared = prepare_params(params)

    out = mlp_forward(x, prepared)
    jax.block_until_ready(out)
    assert out.shape == (B,), out.shape

    # Pure-JAX f32 reference (kernel uses bf16 matmul operands -> loose tol).
    def _ref(xr, ps):
        h = xr.reshape(xr.shape[0], -1)
        for i, (w, b) in enumerate(ps):
            h = h @ w + b
            if i < 3:
                h = jnp.maximum(h, 0.0)
        return jnp.squeeze(h, axis=1)

    ref = _ref(x, params)
    assert jnp.allclose(out, ref, rtol=5e-2, atol=5e-2), (out, ref)

    print("KERNEL_OK")
</pallas_src>

<mosaic_0001>
module attributes {stable_mosaic.version = 11 : i64} {
  func.func @_mlp_kernel(%arg0: i32, %arg1: memref<2x1024xf32, #tpu.memory_space<vmem>>, %arg2: memref<1024x128xbf16, #tpu.memory_space<vmem>>, %arg3: memref<128x64xbf16, #tpu.memory_space<vmem>>, %arg4: memref<64x32xbf16, #tpu.memory_space<vmem>>, %arg5: memref<5x128xf32, #tpu.memory_space<vmem>>, %arg6: memref<2x1xf32, #tpu.memory_space<vmem>>) attributes {dimension_semantics = [#tpu.dimension_semantics<parallel>], iteration_bounds = array<i64: 1>, scalar_prefetch = 0 : i64, scratch_operands = 0 : i64, tpu.core_type = #tpu.core_type<tc>, window_params = [{transform_indices = @transform_0, window_bounds = array<i64: 2, 1024>}, {pipeline_mode = #tpu.pipeline_mode<synchronous>, transform_indices = @transform_1, window_bounds = array<i64: 1024, 128>}, {pipeline_mode = #tpu.pipeline_mode<synchronous>, transform_indices = @transform_2, window_bounds = array<i64: 128, 64>}, {pipeline_mode = #tpu.pipeline_mode<synchronous>, transform_indices = @transform_3, window_bounds = array<i64: 64, 32>}, {pipeline_mode = #tpu.pipeline_mode<synchronous>, transform_indices = @transform_4, window_bounds = array<i64: 5, 128>}, {transform_indices = @transform_5, window_bounds = array<i64: 2, 1>}]} {
    %c0 = arith.constant 0 : index
    %c0_0 = arith.constant 0 : index
    %0 = vector.load %arg5[%c0, %c0_0] : memref<5x128xf32, #tpu.memory_space<vmem>>, vector<1x128xf32>
    %c1 = arith.constant 1 : index
    %c0_1 = arith.constant 0 : index
    %1 = vector.load %arg5[%c1, %c0_1] : memref<5x128xf32, #tpu.memory_space<vmem>>, vector<1x64xf32>
    %c2 = arith.constant 2 : index
    %c0_2 = arith.constant 0 : index
    %2 = vector.load %arg5[%c2, %c0_2] : memref<5x128xf32, #tpu.memory_space<vmem>>, vector<1x32xf32>
    %c3 = arith.constant 3 : index
    %c0_3 = arith.constant 0 : index
    %3 = vector.load %arg5[%c3, %c0_3] : memref<5x128xf32, #tpu.memory_space<vmem>>, vector<1x32xf32>
    %c4 = arith.constant 4 : index
    %c0_4 = arith.constant 0 : index
    %4 = vector.load %arg5[%c4, %c0_4] : memref<5x128xf32, #tpu.memory_space<vmem>>, vector<1x1xf32>
    %c0_5 = arith.constant 0 : index
    %c0_6 = arith.constant 0 : index
    %5 = vector.load %arg1[%c0_5, %c0_6] : memref<2x1024xf32, #tpu.memory_space<vmem>>, vector<2x1024xf32>
    %6 = arith.truncf %5 : vector<2x1024xf32> to vector<2x1024xbf16>
    %c0_7 = arith.constant 0 : index
    %c0_8 = arith.constant 0 : index
    %7 = vector.load %arg2[%c0_7, %c0_8] : memref<1024x128xbf16, #tpu.memory_space<vmem>>, vector<1024x128xbf16>
    %cst = arith.constant dense<0.000000e+00> : vector<2x128xf32>
    %8 = tpu.matmul %6, %7, %cst {dimension_numbers = #tpu.dot_dimension_numbers<[1], [0], [0], [1], [0, 0, 1, 1], [], []>} : vector<2x1024xbf16>, vector<1024x128xbf16>, vector<2x128xf32> -> vector<2x128xf32>
    %9 = vector.broadcast %0 : vector<1x128xf32> to vector<2x128xf32>
    %10 = arith.addf %8, %9 : vector<2x128xf32>
    %cst_9 = arith.constant 0.000000e+00 : f32
    %11 = vector.broadcast %cst_9 : f32 to vector<2x128xf32>
    %12 = arith.maximumf %10, %11 : vector<2x128xf32>
    %13 = arith.truncf %12 : vector<2x128xf32> to vector<2x128xbf16>
    %c0_10 = arith.constant 0 : index
    %c0_11 = arith.constant 0 : index
    %14 = vector.load %arg3[%c0_10, %c0_11] : memref<128x64xbf16, #tpu.memory_space<vmem>>, vector<128x64xbf16>
    %cst_12 = arith.constant dense<0.000000e+00> : vector<2x64xf32>
    %15 = tpu.matmul %13, %14, %cst_12 {dimension_numbers = #tpu.dot_dimension_numbers<[1], [0], [0], [1], [0, 0, 1, 1], [], []>} : vector<2x128xbf16>, vector<128x64xbf16>, vector<2x64xf32> -> vector<2x64xf32>
    %16 = vector.broadcast %1 : vector<1x64xf32> to vector<2x64xf32>
    %17 = arith.addf %15, %16 : vector<2x64xf32>
    %cst_13 = arith.constant 0.000000e+00 : f32
    %18 = vector.broadcast %cst_13 : f32 to vector<2x64xf32>
    %19 = arith.maximumf %17, %18 : vector<2x64xf32>
    %20 = arith.truncf %19 : vector<2x64xf32> to vector<2x64xbf16>
    %c0_14 = arith.constant 0 : index
    %c0_15 = arith.constant 0 : index
    %21 = vector.load %arg4[%c0_14, %c0_15] : memref<64x32xbf16, #tpu.memory_space<vmem>>, vector<64x32xbf16>
    %cst_16 = arith.constant dense<0.000000e+00> : vector<2x32xf32>
    %22 = tpu.matmul %20, %21, %cst_16 {dimension_numbers = #tpu.dot_dimension_numbers<[1], [0], [0], [1], [0, 0, 1, 1], [], []>} : vector<2x64xbf16>, vector<64x32xbf16>, vector<2x32xf32> -> vector<2x32xf32>
    %23 = vector.broadcast %2 : vector<1x32xf32> to vector<2x32xf32>
    %24 = arith.addf %22, %23 : vector<2x32xf32>
    %cst_17 = arith.constant 0.000000e+00 : f32
    %25 = vector.broadcast %cst_17 : f32 to vector<2x32xf32>
    %26 = arith.maximumf %24, %25 : vector<2x32xf32>
    %27 = vector.broadcast %3 : vector<1x32xf32> to vector<2x32xf32>
    %28 = arith.mulf %26, %27 : vector<2x32xf32>
    %cst_18 = arith.constant dense<0.000000e+00> : vector<2xf32>
    %29 = vector.multi_reduction <add>, %28, %cst_18 [1] : vector<2x32xf32> to vector<2xf32>
    %30 = vector.shape_cast %29 : vector<2xf32> to vector<2x1xf32>
    %31 = vector.broadcast %4 : vector<1x1xf32> to vector<2x1xf32>
    %32 = arith.addf %30, %31 : vector<2x1xf32>
    %c0_19 = arith.constant 0 : index
    %c0_20 = arith.constant 0 : index
    %33 = vector.load %arg6[%c0_19, %c0_20] : memref<2x1xf32, #tpu.memory_space<vmem>>, vector<2x1xf32>
    tpu.vector_store %arg6[%c0_19, %c0_20], %32 {strides = array<i32>} : memref<2x1xf32, #tpu.memory_space<vmem>>, vector<2x1xf32>,
    return
  }
  func.func @transform_0(%arg0: i32) -> (i32, i32) {
    %c0_i32 = arith.constant 0 : i32
    %c0_i32_0 = arith.constant 0 : i32
    return %arg0, %c0_i32 : i32, i32
  }
  func.func @transform_1(%arg0: i32) -> (i32, i32) {
    %c0_i32 = arith.constant 0 : i32
    %c0_i32_0 = arith.constant 0 : i32
    %c0_i32_1 = arith.constant 0 : i32
    return %c0_i32, %c0_i32_0 : i32, i32
  }
  func.func @transform_2(%arg0: i32) -> (i32, i32) {
    %c0_i32 = arith.constant 0 : i32
    %c0_i32_0 = arith.constant 0 : i32
    %c0_i32_1 = arith.constant 0 : i32
    return %c0_i32, %c0_i32_0 : i32, i32
  }
  func.func @transform_3(%arg0: i32) -> (i32, i32) {
    %c0_i32 = arith.constant 0 : i32
    %c0_i32_0 = arith.constant 0 : i32
    %c0_i32_1 = arith.constant 0 : i32
    return %c0_i32, %c0_i32_0 : i32, i32
  }
  func.func @transform_4(%arg0: i32) -> (i32, i32) {
    %c0_i32 = arith.constant 0 : i32
    %c0_i32_0 = arith.constant 0 : i32
    %c0_i32_1 = arith.constant 0 : i32
    return %c0_i32, %c0_i32_0 : i32, i32
  }
  func.func @transform_5(%arg0: i32) -> (i32, i32) {
    %c0_i32 = arith.constant 0 : i32
    %c0_i32_0 = arith.constant 0 : i32
    return %arg0, %c0_i32 : i32, i32
  }
}

</mosaic_0001>

<bundles_post_ra>
// kernel: mlp_forward.1
= control target key start
LH: loop header
LB: loop body
LE: loop exit
PB: predicated region body
PF: predicated region fallthrough
CT: control target
= control target key end

     0   :  { %10 = vsyncpa [#allocation3], 0  ;;  %s1308_s18 = smov [#allocation2]   ;;  %s1436_s0 = inlined_call_operand.vmem [shape: f32[2,1024], index: 0, kind: input, shape index: {}]   ;;  %s1437_s1 = inlined_call_operand.hbm [shape: bf16[1024,128], index: 1, kind: input, shape index: {}]   ;;  %s1438_s2 = inlined_call_operand.vmem [shape: bf16[128,64], index: 2, kind: input, shape index: {}]   ;;  %s1439_s3 = inlined_call_operand.vmem [shape: bf16[64,32], index: 3, kind: input, shape index: {}]   ;;  %s1440_s4 = inlined_call_operand.vmem [shape: f32[5,128], index: 4, kind: input, shape index: {}]   ;;  %s1441_s5 = inlined_call_operand.vmem [shape: f32[2,1], index: 5, kind: output, shape index: {}]  }
   0x1   :  { %s18_s19 = sshll.u32 %s1308_s18, 4  ;;  %s1284_s22 = scalar_lea.hbm %s1437_s1, 8192  ;;  %s19_s19 = int_to_ptr.vmem [resolvable:$true] %s18_s19 }
   0x2   :  { %p1285_p0 = scmp.ne.s32.totalorder %s1437_s1, %s1284_s22  ;;  %p1288_p1 = scmp.lt.u32.totalorder %s1284_s22, %s1437_s1 }
   0x4   :  { %p1290_p2 = pnand %p1288_p1, %p1285_p0 }
   0x6   :  { %1293 = shalt.err (!%p1290_p2)
}
   0x7   :  { %s1294_s27 = scalar_lea.vmem %s19_s19, 8192  ;;  %p1299_p4 = scmp.lt.s32.totalorder %s19_s19, %s19_s19 }
   0x8   :  { %p1295_p3 = scmp.ne.s32.totalorder %s19_s19, %s1294_s27  ;;  %p1300_p5 = scmp.lt.s32.totalorder %s1294_s27, %s1294_s27 }
   0xa   :  { %p1301_p6 = por %p1300_p5, %p1299_p4 }
   0xc   :  { %p1302_p7 = pnand %p1301_p6, %p1295_p3 }
   0xe   :  { %1305 = shalt.err (!%p1302_p7)
}
   0xf   :  { %s1309_s28 = smov 64   ;;  %s1310_s29 = smov 4  }
  0x10   :  { %24 = dma.hbm_to_vmem [thread:$0]  %s1437_s1, 8192, %s19_s19, [#allocation3], %s1309_s28, %s1309_s28, %s1310_s29  }
  0x11   :  { %1306 = dma.done.wait [#allocation3], 8192  }
  0x12   :  { %1307 = vsyncadd [#allocation3], 4294959104  ;;  %v1206_v0 = vld [vmem:[#allocation2 + $0x40] sm:$0xff]   ;;  %v1210_v4 = vld [vmem:[#allocation2 + $0x48] sm:$0xff]   ;;  %v1311_v22 = vmov 1983009808   ;;  %v48_v24 = vlaneseq }
  0x13   :  { %v1207_v1 = vld [vmem:[#allocation2 + $0xc0] sm:$0xff]   ;;  %1066 = vmatprep.subr.bf16.mxu0 %v1206_v0  ;;  %v1211_v5 = vld [vmem:[#allocation2 + $0xc8] sm:$0xff]   ;;  %v1214_v8 = vld [vmem:[#allocation2 + $0x50] sm:$0xff]   ;;  %v46_v23 = vunpack.c.l.s4 %v1311_v22  ;;  %vm1313_vm0 = vmmov 0   ;;  %vm918_vm1 = vcmask 523264   ;;  %vm968_vm2 = vcmask 254976  }
  0x14   :  { %v1208_v2 = vld [vmem:[#allocation2] sm:$0xff]   ;;  %1088 = vmatprep.subr.bf16.mxu1 %v1207_v1  ;;  %v1212_v6 = vld [vmem:[#allocation2 + $0x8] sm:$0xff]   ;;  %v1215_v9 = vld [vmem:[#allocation2 + $0xd0] sm:$0xff]   ;;  %v49_v30 = vshrl.u32 %v48_v24, 7  ;;  %vm977_vm3 = vcmask 1024  }
  0x15   :  { %v1209_v3 = vld [vmem:[#allocation2 + $0x80] sm:$0xff]   ;;  %1067 = vmatpush3.bf16.msra.mxu0 %v1208_v2  ;;  %v1213_v7 = vld [vmem:[#allocation2 + $0x88] sm:$0xff]   ;;  %v1216_v10 = vld [vmem:[#allocation2 + $0x10] sm:$0xff]   ;;  %v47_v29 = vunpack.c.0.s8 %v46_v23 }
  0x16   :  { %1089 = vmatpush3.bf16.msra.mxu1 %v1209_v3  ;;  %1068 = vmatprep.subr.bf16.mxu0 %v1210_v4  ;;  %v1217_v11 = vld [vmem:[#allocation2 + $0x90] sm:$0xff]   ;;  %v1218_v12 = vld [vmem:[#allocation2 + $0x58] sm:$0xff]   ;;  %v1222_v16 = vld [vmem:[#allocation2 + $0x60] sm:$0xff]  }
  0x17   :  { %1090 = vmatprep.subr.bf16.mxu1 %v1211_v5  ;;  %v1219_v13 = vld [vmem:[#allocation2 + $0xd8] sm:$0xff]   ;;  %v1223_v17 = vld [vmem:[#allocation2 + $0xe0] sm:$0xff]   ;;  %v1226_v20 = vld [vmem:[#allocation2 + $0x68] sm:$0xff]   ;;  %v1356_v35 = vsub.s32 %v47_v29, %v49_v30 }
  0x18   :  { %v1220_v14 = vld [vmem:[#allocation2 + $0x18] sm:$0xff]   ;;  %v1224_v18 = vld [vmem:[#allocation2 + $0x20] sm:$0xff]   ;;  %v1227_v21 = vld [vmem:[#allocation2 + $0xe8] sm:$0xff]  }
  0x19   :  { %1069 = vmatpush3.bf16.msra.mxu0 %v1212_v6  ;;  %v1221_v15 = vld [vmem:[#allocation2 + $0x98] sm:$0xff]   ;;  %v1225_v19 = vld [vmem:[#allocation2 + $0xa0] sm:$0xff]   ;;  %v1228_v25 = vld [vmem:[#allocation2 + $0x28] sm:$0xff]  }
  0x1a   :  { %1091 = vmatpush3.bf16.msra.mxu1 %v1213_v7  ;;  %1070 = vmatprep.subr.bf16.mxu0 %v1214_v8  ;;  %v1229_v26 = vld [vmem:[#allocation2 + $0xa8] sm:$0xff]   ;;  %v1230_v27 = vld [vmem:[#allocation2 + $0x70] sm:$0xff]   ;;  %v1234_v33 = vld [vmem:[#allocation2 + $0x78] sm:$0xff]  }
  0x1b   :  { %1092 = vmatprep.subr.bf16.mxu1 %v1215_v9  ;;  %v1231_v28 = vld [vmem:[#allocation2 + $0xf0] sm:$0xff]   ;;  %v1235_v34 = vld [vmem:[#allocation2 + $0xf8] sm:$0xff]   ;;  %v40_v38 = vld [vmem:[%s1436_s0] sm:$0xff] }
  0x1c   :  { %v1232_v31 = vld [vmem:[#allocation2 + $0x30] sm:$0xff]   ;;  %v1236_v36 = vld [vmem:[#allocation2 + $0x38] sm:$0xff]   ;;  %v51_v39 = vrot.slane %v40_v38, %v1356_v35  ;;  %v44_v40 = vcombine.high %v40_v38, %v40_v38  ;;  %v1239_v41 = vld [vmem:[#allocation2 + $0x140] sm:$0xff]  }
  0x1d   :  { %1071 = vmatpush3.bf16.msra.mxu0 %v1216_v10  ;;  %v1233_v32 = vld [vmem:[#allocation2 + $0xb0] sm:$0xff]   ;;  %v1237_v37 = vld [vmem:[#allocation2 + $0xb8] sm:$0xff]   ;;  %v1240_v42 = vld [vmem:[#allocation2 + $0x1c0] sm:$0xff]  }
  0x1e   :  { %1093 = vmatpush3.bf16.msra.mxu1 %v1217_v11  ;;  %1072 = vmatprep.subr.bf16.mxu0 %v1218_v12  ;;  %v59_v43 = vcombine.high %v51_v39, %v51_v39  ;;  %v58_v44 = vrot.slane %v44_v40, %v1356_v35  ;;  %v86_v45 = vpack.c.bf16 %v51_v39, %v51_v39  ;;  %v1241_v46 = vld [vmem:[#allocation2 + $0x100] sm:$0xff]   ;;  %v1243_v51 = vld [vmem:[#allocation2 + $0x148] sm:$0xff]   ;;  %v1247_v56 = vld [vmem:[#allocation2 + $0x150] sm:$0xff]  }
  0x1f   :  { %1094 = vmatprep.subr.bf16.mxu1 %v1219_v13  ;;  %v1242_v49 = vld [vmem:[#allocation2 + $0x180] sm:$0xff]   ;;  %v1244_v53 = vld [vmem:[#allocation2 + $0x1c8] sm:$0xff]   ;;  %v1248_v57 = vld [vmem:[#allocation2 + $0x1d0] sm:$0xff]  }
  0x20   :  { %v87_v47 = vpack.c.bf16 %v59_v43, %v59_v43  ;;  %v60_v48 = vcombine.high %v58_v44, %v58_v44  ;;  %v88_v50 = vpack.c.bf16 %v58_v44, %v58_v44  ;;  %v1245_v54 = vld [vmem:[#allocation2 + $0x108] sm:$0xff]   ;;  %v1249_v58 = vld [vmem:[#allocation2 + $0x110] sm:$0xff]   ;;  %v1251_v60 = vld [vmem:[#allocation2 + $0x158] sm:$0xff]  }
  0x21   :  { %1073 = vmatpush3.bf16.msra.mxu0 %v1220_v14  ;;  %v1246_v55 = vld [vmem:[#allocation2 + $0x188] sm:$0xff]   ;;  %v1250_v59 = vld [vmem:[#allocation2 + $0x190] sm:$0xff]   ;;  %v1252_v61 = vld [vmem:[#allocation2 + $0x1d8] sm:$0xff]  }
  0x22   :  { %1095 = vmatpush3.bf16.msra.mxu1 %v1221_v15  ;;  %1074 = vmatprep.subr.bf16.mxu0 %v1222_v16  ;;  %v89_v52 = vpack.c.bf16 %v60_v48, %v60_v48  ;;  %v1253_v62 = vld [vmem:[#allocation2 + $0x118] sm:$0xff]   ;;  %v1255_v0 = vld [vmem:[#allocation2 + $0x160] sm:$0xff]   ;;  %v1259_v4 = vld [vmem:[#allocation2 + $0x168] sm:$0xff]  }
  0x23   :  { %1096 = vmatprep.subr.bf16.mxu1 %v1223_v17  ;;  %642 = vmatprep.mubr.bf16.mxu0 %v87_v47  ;;  %v1254_v63 = vld [vmem:[#allocation2 + $0x198] sm:$0xff]   ;;  %v1256_v1 = vld [vmem:[#allocation2 + $0x1e0] sm:$0xff]   ;;  %v1260_v5 = vld [vmem:[#allocation2 + $0x1e8] sm:$0xff]  }
  0x24   :  { %682 = vmatprep.mubr.bf16.mxu1 %v89_v52  ;;  %v1257_v2 = vld [vmem:[#allocation2 + $0x120] sm:$0xff]   ;;  %v1261_v6 = vld [vmem:[#allocation2 + $0x128] sm:$0xff]   ;;  %v1263_v8 = vld [vmem:[#allocation2 + $0x170] sm:$0xff]  }
  0x25   :  { %1075 = vmatpush3.bf16.msra.mxu0 %v1224_v18  ;;  %v1258_v3 = vld [vmem:[#allocation2 + $0x1a0] sm:$0xff]   ;;  %v1262_v7 = vld [vmem:[#allocation2 + $0x1a8] sm:$0xff]   ;;  %v1264_v9 = vld [vmem:[#allocation2 + $0x1f0] sm:$0xff]  }
  0x26   :  { %1097 = vmatpush3.bf16.msra.mxu1 %v1225_v19  ;;  %1076 = vmatprep.subr.bf16.mxu0 %v1226_v20  ;;  %v1265_v10 = vld [vmem:[#allocation2 + $0x130] sm:$0xff]   ;;  %v1267_v12 = vld [vmem:[#allocation2 + $0x178] sm:$0xff]   ;;  %v41_v15 = vld [vmem:[%s1436_s0 + $0x8] sm:$0xff] }
  0x27   :  { %1098 = vmatprep.subr.bf16.mxu1 %v1227_v21  ;;  %v1266_v11 = vld [vmem:[#allocation2 + $0x1b0] sm:$0xff]   ;;  %v1268_v13 = vld [vmem:[#allocation2 + $0x1f8] sm:$0xff]   ;;  %v68_v17 = vrot.slane %v41_v15, %v1356_v35  ;;  %v61_v18 = vcombine.high %v41_v15, %v41_v15  ;;  %v984_v38 = vld [vmem:[%s1440_s4] ss:$0 sm:$0xff] }
  0x28   :  { %v1269_v14 = vld [vmem:[#allocation2 + $0x138] sm:$0xff]   ;;  %v1274_v29 = vld [vmem:[%s1438_s2 + $0x10] sm:$0xff]   ;;  %v1064_v15 = vld [vmem:[%s1440_s4 + $0x3] ss:$0 sm:$0xff] }
  0x29   :  { %1077 = vmatpush3.bf16.msra.mxu0 %v1228_v25  ;;  %v1270_v16 = vld [vmem:[#allocation2 + $0x1b8] sm:$0xff]   ;;  %v76_v19 = vcombine.high %v68_v17, %v68_v17  ;;  %v75_v20 = vrot.slane %v61_v18, %v1356_v35  ;;  %v90_v21 = vpack.c.bf16 %v68_v17, %v68_v17  ;;  %v1280_v35 = vld [vmem:[%s1439_s3] sm:$0xff]  }
  0x2a   :  { %1099 = vmatpush3.bf16.msra.mxu1 %v1229_v26  ;;  %1078 = vmatprep.subr.bf16.mxu0 %v1230_v27  ;;  %v1272_v26 = vld [vmem:[%s1438_s2] sm:$0xff]   ;;  %v1312_v27 = vmov 0.0   ;;  %v1275_v30 = vld [vmem:[%s1438_s2 + $0x18] sm:$0xff]  }
  0x2b   :  { %1100 = vmatprep.subr.bf16.mxu1 %v1231_v28  ;;  %v91_v22 = vpack.c.bf16 %v76_v19, %v76_v19  ;;  %v77_v23 = vcombine.high %v75_v20, %v75_v20  ;;  %v92_v24 = vpack.c.bf16 %v75_v20, %v75_v20  ;;  %v1273_v28 = vld [vmem:[%s1438_s2 + $0x8] sm:$0xff]   ;;  %v1065_v20 = vld [vmem:[%s1440_s4 + $0x4] ss:$0 sm:$0xff] }
  0x2d   :  { %1079 = vmatpush3.bf16.msra.mxu0 %v1232_v31  ;;  %v93_v25 = vpack.c.bf16 %v77_v23, %v77_v23  ;;  %v1276_v31 = vld [vmem:[%s1438_s2 + $0x20] sm:$0xff]  }
  0x2e   :  { %1101 = vmatpush3.bf16.msra.mxu1 %v1233_v32  ;;  %1080 = vmatprep.subr.bf16.mxu0 %v1234_v33  ;;  %v1277_v32 = vld [vmem:[%s1438_s2 + $0x28] sm:$0xff]   ;;  %v1278_v33 = vld [vmem:[%s1438_s2 + $0x30] sm:$0xff]  }
  0x2f   :  { %1102 = vmatprep.subr.bf16.mxu1 %v1235_v34  ;;  %v1279_v34 = vld [vmem:[%s1438_s2 + $0x38] sm:$0xff]  }
  0x31   :  { %1081 = vmatpush3.bf16.msra.mxu0 %v1236_v36  ;;  %v1281_v36 = vld [vmem:[%s1439_s3 + $0x8] sm:$0xff]  }
  0x32   :  { %1103 = vmatpush3.bf16.msra.mxu1 %v1237_v37  ;;  %1110 = vmatprep.subr.bf16.mxu0 %v1239_v41 }
  0x33   :  { %1132 = vmatprep.subr.bf16.mxu1 %v1240_v42 }
  0x34   :  { %643 = vmatmul.mubr.bf16.vlgmr.msra.gmra.mrb[0].mxu0 %v86_v45 }
  0x35   :  { %1111 = vmatpush3.bf16.msra.mxu0 %v1241_v46  ;;  %683 = vmatmul.mubr.bf16.vlgmr.msra.gmra.mrb[0].mxu1 %v88_v50 }
  0x36   :  { %1112 = vmatprep.subr.bf16.mxu0 %v1243_v51  ;;  %1133 = vmatpush3.bf16.msra.mxu1 %v1242_v49 }
  0x37   :  { %1134 = vmatprep.subr.bf16.mxu1 %v1244_v53  ;;  %722 = vmatprep.mubr.bf16.mxu0 %v91_v22 }
  0x38   :  { %762 = vmatprep.mubr.bf16.mxu1 %v93_v25 }
  0x39   :  { %1113 = vmatpush3.bf16.msra.mxu0 %v1245_v54 }
  0x3a   :  { %1114 = vmatprep.subr.bf16.mxu0 %v1247_v56  ;;  %1135 = vmatpush3.bf16.msra.mxu1 %v1246_v55 }
  0x3b   :  { %1136 = vmatprep.subr.bf16.mxu1 %v1248_v57 }
  0x3d   :  { %1115 = vmatpush3.bf16.msra.mxu0 %v1249_v58 }
  0x3e   :  { %1116 = vmatprep.subr.bf16.mxu0 %v1251_v60  ;;  %1137 = vmatpush3.bf16.msra.mxu1 %v1250_v59 }
  0x3f   :  { %1138 = vmatprep.subr.bf16.mxu1 %v1252_v61 }
  0x41   :  { %1117 = vmatpush3.bf16.msra.mxu0 %v1253_v62 }
  0x42   :  { %1118 = vmatprep.subr.bf16.mxu0 %v1255_v0  ;;  %1139 = vmatpush3.bf16.msra.mxu1 %v1254_v63  ;;  %v1282_v0 = vld [vmem:[%s1439_s3 + $0x10] sm:$0xff]  }
  0x43   :  { %1140 = vmatprep.subr.bf16.mxu1 %v1256_v1  ;;  %v1283_v1 = vld [vmem:[%s1439_s3 + $0x18] sm:$0xff]  }
  0x45   :  { %1119 = vmatpush3.bf16.msra.mxu0 %v1257_v2  ;;  %v1049_v2 = vld [vmem:[%s1440_s4 + $0x1] ss:$0 sm:$0xff] }
  0x46   :  { %1120 = vmatprep.subr.bf16.mxu0 %v1259_v4  ;;  %1141 = vmatpush3.bf16.msra.mxu1 %v1258_v3 }
  0x47   :  { %1142 = vmatprep.subr.bf16.mxu1 %v1260_v5 }
  0x49   :  { %1121 = vmatpush3.bf16.msra.mxu0 %v1261_v6 }
  0x4a   :  { %1122 = vmatprep.subr.bf16.mxu0 %v1263_v8  ;;  %1143 = vmatpush3.bf16.msra.mxu1 %v1262_v7 }
  0x4b   :  { %1144 = vmatprep.subr.bf16.mxu1 %v1264_v9 }
  0x4d   :  { %1123 = vmatpush3.bf16.msra.mxu0 %v1265_v10  ;;  %v1058_v10 = vld [vmem:[%s1440_s4 + $0x2] ss:$0 sm:$0xff] }
  0x4e   :  { %1124 = vmatprep.subr.bf16.mxu0 %v1267_v12  ;;  %1145 = vmatpush3.bf16.msra.mxu1 %v1266_v11 }
  0x4f   :  { %1146 = vmatprep.subr.bf16.mxu1 %v1268_v13 }
  0x51   :  { %1125 = vmatpush3.bf16.msra.mxu0 %v1269_v14 }
  0x52   :  { %1147 = vmatpush3.bf16.msra.mxu1 %v1270_v16  ;;  %1168 = vmatprep.subr.bf16.mxu0 %v1312_v27 }
  0x53   :  { %1188 = vmatprep.subr.bf16.mxu1 %v1312_v27 }
  0x54   :  { %723 = vmatmul.mubr.bf16.vlgmr.msra.gmra.mrb[4].mxu0 %v90_v21 }
  0x55   :  { %763 = vmatmul.mubr.bf16.vlgmr.msra.gmra.mrb[4].mxu1 %v92_v24  ;;  %1169 = vmatpush3.bf16.msra.mxu0 %v1272_v26 }
  0x56   :  { %1170 = vmatprep.subr.bf16.mxu0 %v1312_v27  ;;  %1184 = vmatprep.mubr.msk.bf16.mxu0 %vm1313_vm0, %v1312_v27 }
  0x57   :  { %1196 = vmatprep.mubr.msk.bf16.mxu1 %vm1313_vm0, %v1312_v27  ;;  %1189 = vmatpush3.bf16.msra.mxu1 %v1280_v35 }
  0x58   :  { %1190 = vmatprep.subr.bf16.mxu1 %v1312_v27 }
  0x59   :  { %1171 = vmatpush3.bf16.msra.mxu0 %v1273_v28 }
  0x5a   :  { %1172 = vmatprep.subr.bf16.mxu0 %v1312_v27 }
  0x5b   :  { %1191 = vmatpush3.bf16.msra.mxu1 %v1281_v36 }
  0x5c   :  { %1192 = vmatprep.subr.bf16.mxu1 %v1312_v27 }
  0x5d   :  { %1173 = vmatpush3.bf16.msra.mxu0 %v1274_v29 }
  0x5e   :  { %1174 = vmatprep.subr.bf16.mxu0 %v1312_v27 }
  0x5f   :  { %1193 = vmatpush3.bf16.msra.mxu1 %v1282_v0 }
  0x60   :  { %1194 = vmatprep.subr.bf16.mxu1 %v1312_v27 }
  0x61   :  { %1175 = vmatpush3.bf16.msra.mxu0 %v1275_v30 }
  0x62   :  { %1176 = vmatprep.subr.bf16.mxu0 %v1312_v27 }
  0x63   :  { %1195 = vmatpush3.bf16.msra.mxu1 %v1283_v1 }
  0x65   :  { %1177 = vmatpush3.bf16.msra.mxu0 %v1276_v31 }
  0x66   :  { %1178 = vmatprep.subr.bf16.mxu0 %v1312_v27 }
  0x69   :  { %1179 = vmatpush3.bf16.msra.mxu0 %v1277_v32 }
  0x6a   :  { %1180 = vmatprep.subr.bf16.mxu0 %v1312_v27 }
  0x6d   :  { %1181 = vmatpush3.bf16.msra.mxu0 %v1278_v33 }
  0x6e   :  { %1182 = vmatprep.subr.bf16.mxu0 %v1312_v27 }
  0x71   :  { %1183 = vmatpush3.bf16.msra.mxu0 %v1279_v34 }
 0x107   :  { %v1082_v37 = vpop.f32.mrb[0].mxu0 }
 0x108   :  { %v1083_v39 = vpop.f32.mrb[1].mxu0  ;;  %v1104_v40 = vpop.f32.mrb[0].mxu1 }
 0x109   :  { %v1084_v41 = vadd.f32 %v1083_v39, %v1082_v37  ;;  %v1085_v42 = vpop.f32.mrb[2].mxu0  ;;  %v1105_v43 = vpop.f32.mrb[1].mxu1 }
 0x10a   :  { %v1086_v44 = vpop.f32.mrb[3].mxu0  ;;  %v1106_v46 = vadd.f32 %v1105_v43, %v1104_v40  ;;  %v1107_v47 = vpop.f32.mrb[2].mxu1 }
 0x10b   :  { %v645_v45 = vadd.f32 %v1084_v41, %v984_v38  ;;  %v1108_v48 = vpop.f32.mrb[3].mxu1 }
 0x10d   :  { %v685_v49 = vadd.f32 %v1106_v46, %v645_v45 }
 0x127   :  { %v1126_v50 = vpop.f32.mrb[4].mxu0 }
 0x128   :  { %v1127_v51 = vpop.f32.mrb[5].mxu0  ;;  %v1148_v52 = vpop.f32.mrb[4].mxu1 }
 0x129   :  { %v1128_v53 = vadd.f32 %v1127_v51, %v1126_v50  ;;  %v1129_v54 = vpop.f32.mrb[6].mxu0  ;;  %v1149_v55 = vpop.f32.mrb[5].mxu1 }
 0x12a   :  { %v1130_v56 = vpop.f32.mrb[7].mxu0  ;;  %v1150_v58 = vadd.f32 %v1149_v55, %v1148_v52  ;;  %v1151_v59 = vpop.f32.mrb[6].mxu1 }
 0x12b   :  { %v725_v57 = vadd.f32 %v1128_v53, %v685_v49  ;;  %v1152_v60 = vpop.f32.mrb[7].mxu1 }
 0x12d   :  { %v765_v61 = vadd.f32 %v1150_v58, %v725_v57 }
 0x12f   :  { %v770_v62 = vmax.f32 %v765_v61, 0.0 }
 0x131   :  { %v771_v63 = vpack.c.bf16 %v770_v62, %v770_v62 }
 0x133   :  { %1185 = vmatmul.mubr.bf16.vlgmr.msra.gmra.mrb[8].mxu0 %v771_v63 }
 0x206   :  { %v874_v3 = vpop.f32.mrb[8].mxu0 }
 0x207   :  { %v875_v4 = vadd.f32 %v1049_v2, %v874_v3  ;;  %v1186_v5 = vpop.f32.mrb[9].mxu0 }
 0x208   :  { %v877_v6 = vpop.f32.mrb[10].mxu0 }
 0x209   :  { %v880_v7 = vmax.f32 %v875_v4, 0.0  ;;  %v1187_v8 = vpop.f32.mrb[11].mxu0 }
 0x20b   :  { %v881_v9 = vpack.c.bf16 %v880_v7, %v880_v7 }
 0x20d   :  { %1197 = vmatmul.mubr.msk.bf16.vlgmr.msra.gmra.mrb[8].mxu1 %vm918_vm1, %v881_v9 }
 0x2e0   :  { %v956_v11 = vpop.f32.mrb[8].mxu1 }
 0x2e1   :  { %v957_v12 = vadd.f32 %v1058_v10, %v956_v11  ;;  %v1198_v13 = vpop.f32.mrb[9].mxu1 }
 0x2e2   :  { %v959_v14 = vpop.f32.mrb[10].mxu1 }
 0x2e3   :  { %v962_v16 = vmax.f32 %v957_v12, 0.0  ;;  %v1199_v17 = vpop.f32.mrb[11].mxu1 }
 0x2e5   :  { %v967_v18 = vmul.f32 %v1064_v15, %v962_v16 }
 0x2e7   :  { %v969_v19 = vsel %vm968_vm2, %v967_v18, 0.0 }
 0x2e8   :  { %970 = vadd.xlane.f32.xlu0 %v969_v19 }
 0x375   :  { %v971_v21 = vpop.xlane.xlu0 %970 }
 0x376   :  { %v976_v22 = vadd.f32 %v1065_v20, %v971_v21 }
 0x378   :  { %978 = vst.msk [vmem:[%s1441_s5] sm:$0x3] %vm977_vm3, %v976_v22 }
 0x379   :  { %983 = vsyncpa [#allocation3], 1 }

</bundles_post_ra>
